<compile_context>
chip_gen: v7x
topology: tpu7x:2x2x1
jax: 0.10.0
libtpu: 0.0.40
codegen_flags: <defaults>
</compile_context>

<pallas_src>
import numpy as np
import jax
import jax.numpy as jnp
from jax.experimental import pallas as pl
from jax.experimental.pallas import tpu as pltpu

# ----------------------- static "config" (stands in for parse_config) --------------
B = 2                 # batch
C_IN = 4              # conv1.in_channels
C_OUT = 8             # conv1.out_channels (== fc1.in_channels per-pixel width)
K = 3                 # conv1.kernel_size
H = W = 10            # input spatial size
OH = OW = H - K + 1   # 8  -> domain_node
FC1_IN = C_OUT * OH * OW       # 8 * 8 * 8 = 512
FC1_OUT = 64          # fc1.out_channels == fc2.in_channels
FC2_OUT = 32          # fc2.out_channels == fc3.in_channels
N_ACTIONS = 5         # action_head.out_channels
PAD_N = 128           # lane-dense padded action dim (multiple of 128)
CHW = C_IN * H * W    # 400


def _round_up(n, m):
    return (n + m - 1) // m * m


# ------------------------------ fused Pallas kernel --------------------------------
def actor_fused_kernel(x_ref, wc_ref, bc_ref, w1_ref, b1_ref, w2_ref, b2_ref,
                       w3_ref, b3_ref, o_ref):
    # conv1 (pre-unrolled into a dense bf16 matmul) + bias + relu.
    # Output columns are already in torch's channel-major flatten order (oc, oh, ow),
    # so this IS fc1's flattened input -- no in-kernel reshape/transpose anywhere.
    flat = jnp.dot(x_ref[...], wc_ref[...], preferred_element_type=jnp.float32)
    flat = jnp.maximum(flat + bc_ref[...], 0.0)
    # fc1 + relu (bf16 MXU, f32 accumulate)
    h1 = jnp.dot(flat.astype(jnp.bfloat16), w1_ref[...],
                 preferred_element_type=jnp.float32) + b1_ref[...]
    h1 = jnp.maximum(h1, 0.0)
    # fc2 + relu
    h2 = jnp.dot(h1.astype(jnp.bfloat16), w2_ref[...],
                 preferred_element_type=jnp.float32) + b2_ref[...]
    h2 = jnp.maximum(h2, 0.0)
    # action head, padded to 128 lanes (pad bias = -1e30 -> exp underflows to 0)
    logits = jnp.dot(h2.astype(jnp.bfloat16), w3_ref[...],
                     preferred_element_type=jnp.float32) + b3_ref[...]
    m = jnp.max(logits, axis=1, keepdims=True)
    e = jnp.exp(logits - m)
    denom = jnp.sum(e, axis=1, keepdims=True)
    o_ref[...] = e / denom                      # exact normalization (f32)


# --------------------------------- wrapper ------------------------------------------
def actor_forward(x_nchw, params):
    """Full Actor forward.  x_nchw: [batch, C_IN, H, W] float32 -> [batch, N_ACTIONS]."""
    wc, bc, w1, b1, w2, b2, w3p, b3p = params
    b = x_nchw.shape[0]

    # Row-major NCHW flatten (layout no-op) + bf16 cast for the MXU.
    x2d = x_nchw.reshape(b, CHW).astype(jnp.bfloat16)

    # Batch tiling: full (8,128) tiles; up to 128 rows per grid step, weights stay
    # VMEM-resident across the whole grid (their index_map is constant).
    bm = min(128, _round_up(b, 8))
    b_pad = _round_up(b, bm)
    if b_pad != b:
        x2d = jnp.pad(x2d, ((0, b_pad - b), (0, 0)))
    grid = (b_pad // bm,)

    const = lambda i: (0, 0)       # weights / biases: same block every grid step
    flops = 2 * b_pad * (CHW * FC1_IN + FC1_IN * FC1_OUT
                         + FC1_OUT * FC2_OUT + FC2_OUT * PAD_N)
    bytes_accessed = (2 * (b_pad * CHW + CHW * FC1_IN + FC1_IN * FC1_OUT
                           + FC1_OUT * FC2_OUT + FC2_OUT * PAD_N)        # bf16
                      + 4 * (FC1_IN + FC1_OUT + FC2_OUT + PAD_N          # f32 biases
                             + b_pad * PAD_N))                           # f32 output

    probs_pad = pl.pallas_call(
        actor_fused_kernel,
        out_shape=jax.ShapeDtypeStruct((b_pad, PAD_N), jnp.float32),
        grid=grid,
        in_specs=[
            pl.BlockSpec((bm, CHW), lambda i: (i, 0)),        # x tile per step
            pl.BlockSpec((CHW, FC1_IN), const),               # wconv (bf16, resident)
            pl.BlockSpec((1, FC1_IN), const),                 # bconv (f32)
            pl.BlockSpec((FC1_IN, FC1_OUT), const),           # w1
            pl.BlockSpec((1, FC1_OUT), const),                # b1
            pl.BlockSpec((FC1_OUT, FC2_OUT), const),          # w2
            pl.BlockSpec((1, FC2_OUT), const),                # b2
            pl.BlockSpec((FC2_OUT, PAD_N), const),            # w3 (padded to 128)
            pl.BlockSpec((1, PAD_N), const),                  # b3 (padded, -1e30)
        ],
        out_specs=pl.BlockSpec((bm, PAD_N), lambda i: (i, 0)),
        compiler_params=pltpu.CompilerParams(
            dimension_semantics=("parallel",)),               # v7x: use both TCs
        cost_estimate=pl.CostEstimate(
            flops=flops, transcendentals=b_pad * PAD_N, bytes_accessed=bytes_accessed),
    )(x2d, wc, bc, w1, b1, w2, b2, w3p, b3p)

    return probs_pad[:b, :N_ACTIONS]            # drop batch padding + lane padding


# --------------------------- deterministic parameter init --------------------------
def init_params(key):
    ks = jax.random.split(key, 8)

    def uniform(k, shape, fan_in):
        bound = 1.0 / jnp.sqrt(float(fan_in))
        return jax.random.uniform(k, shape, jnp.float32, -bound, bound)

    # "torch-form" parameters (kept in f32 for the reference)
    wc_torch = uniform(ks[0], (C_OUT, C_IN, K, K), C_IN * K * K)   # Conv2d weight [OC,C,K,K]
    bc_torch = uniform(ks[1], (C_OUT,), C_IN * K * K)              # Conv2d bias   [OC]
    w1 = uniform(ks[2], (FC1_IN, FC1_OUT), FC1_IN)                 # Linear stored [in,out]
    b1 = uniform(ks[3], (1, FC1_OUT), FC1_IN)
    w2 = uniform(ks[4], (FC1_OUT, FC2_OUT), FC1_OUT)
    b2 = uniform(ks[5], (1, FC2_OUT), FC1_OUT)
    w3 = uniform(ks[6], (FC2_OUT, N_ACTIONS), FC2_OUT)
    b3 = uniform(ks[7], (N_ACTIONS,), FC2_OUT)

    # --- one-time: unroll the conv into a dense matmul weight [C*H*W, OC*OH*OW] ---
    # Wconv[(c,h,w), (oc,oh,ow)] = wc_torch[oc, c, h-oh, w-ow] when 0 <= h-oh, w-ow < K,
    # so x.reshape(B, C*H*W) @ Wconv equals the conv output flattened in torch's
    # channel-major order (matches `x.view(-1, OC*dn*dn)` on an NCHW tensor).
    wk = np.transpose(np.asarray(wc_torch), (1, 2, 3, 0))          # [C, K, K, OC]
    wconv6 = np.zeros((C_IN, H, W, C_OUT, OH, OW), np.float32)
    for oh in range(OH):
        for ow in range(OW):
            wconv6[:, oh:oh + K, ow:ow + K, :, oh, ow] = wk
    wconv = jnp.asarray(wconv6.reshape(CHW, FC1_IN), dtype=jnp.bfloat16)  # [400, 512] bf16
    bconv = jnp.repeat(bc_torch, OH * OW)[None, :]                 # [1, 512] f32

    # --- lane-dense action head: pad to 128 output lanes (pad bias -> -inf-ish) ---
    w3p = jnp.zeros((FC2_OUT, PAD_N), jnp.float32).at[:, :N_ACTIONS].set(w3)
    b3p = jnp.full((1, PAD_N), -1e30, jnp.float32).at[0, :N_ACTIONS].set(b3)

    pallas_params = (wconv, bconv,
                     w1.astype(jnp.bfloat16), b1,
                     w2.astype(jnp.bfloat16), b2,
                     w3p.astype(jnp.bfloat16), b3p)
    torch_params = (wc_torch, bc_torch, w1, b1, w2, b2, w3, b3)
    return pallas_params, torch_params


# ------------------------------ references ------------------------------------------
def actor_reference(x_nchw, torch_params):
    """Exact f32 torch-semantics reference (conv + flatten + 3 linears + softmax)."""
    wc, bc, w1, b1, w2, b2, w3, b3 = torch_params
    conv = jax.lax.conv_general_dilated(
        x_nchw, wc, window_strides=(1, 1), padding="VALID",
        dimension_numbers=("NCHW", "OIHW", "NCHW")) + bc[None, :, None, None]
    conv = jnp.maximum(conv, 0.0)                                  # [B, OC, OH, OW]
    flat = conv.reshape(x_nchw.shape[0], FC1_IN)                   # torch channel-major flatten
    h1 = jnp.maximum(flat @ w1 + b1, 0.0)
    h2 = jnp.maximum(h1 @ w2 + b2, 0.0)
    logits = h2 @ w3 + b3[None, :]
    return jax.nn.softmax(logits, axis=1)


def actor_reference_quantized(x_nchw, pallas_params):
    """Plain-JAX mirror of the kernel's bf16-weight / f32-accumulate arithmetic."""
    wc, bc, w1, b1, w2, b2, w3p, b3p = pallas_params
    x2d = x_nchw.reshape(x_nchw.shape[0], CHW).astype(jnp.bfloat16)
    flat = jnp.maximum(jnp.dot(x2d, wc, preferred_element_type=jnp.float32) + bc, 0.0)
    h1 = jnp.maximum(jnp.dot(flat.astype(jnp.bfloat16), w1,
                             preferred_element_type=jnp.float32) + b1, 0.0)
    h2 = jnp.maximum(jnp.dot(h1.astype(jnp.bfloat16), w2,
                             preferred_element_type=jnp.float32) + b2, 0.0)
    logits = jnp.dot(h2.astype(jnp.bfloat16), w3p,
                     preferred_element_type=jnp.float32) + b3p
    return jax.nn.softmax(logits, axis=1)[:, :N_ACTIONS]


if __name__ == "__main__":
    root = jax.random.PRNGKey(0)
    k_x, k_p = jax.random.split(root)

    x = jax.random.normal(k_x, (B, C_IN, H, W), jnp.float32)       # NCHW input
    pallas_params, torch_params = init_params(k_p)

    probs = jax.jit(actor_forward)(x, pallas_params)
    probs = jax.block_until_ready(probs)

    assert probs.shape == (B, N_ACTIONS)
    assert bool(jnp.all(jnp.isfinite(probs)))
    # Exact divide in the kernel -> rows sum to 1 up to f32 rounding.
    assert bool(jnp.allclose(jnp.sum(probs, axis=1), 1.0, atol=1e-5))

    # Tight check against a plain-JAX mirror of the same bf16/f32 arithmetic.
    ref_q = actor_reference_quantized(x, pallas_params)
    assert bool(jnp.allclose(probs, ref_q, atol=1e-3))

    # Semantic check against the exact f32 torch-style reference (bf16 weights
    # introduce ~1e-3-level logit error -> loose probability tolerance).
    ref = actor_reference(x, torch_params)
    assert bool(jnp.allclose(probs, ref, atol=2e-2))

    print("KERNEL_OK")
</pallas_src>

<mosaic_0001>
module attributes {stable_mosaic.version = 11 : i64} {
  func.func @actor_fused_kernel(%arg0: i32, %arg1: memref<8x400xbf16, #tpu.memory_space<vmem>>, %arg2: memref<400x512xbf16, #tpu.memory_space<vmem>>, %arg3: memref<1x512xf32, #tpu.memory_space<vmem>>, %arg4: memref<512x64xbf16, #tpu.memory_space<vmem>>, %arg5: memref<1x64xf32, #tpu.memory_space<vmem>>, %arg6: memref<64x32xbf16, #tpu.memory_space<vmem>>, %arg7: memref<1x32xf32, #tpu.memory_space<vmem>>, %arg8: memref<32x128xbf16, #tpu.memory_space<vmem>>, %arg9: memref<1x128xf32, #tpu.memory_space<vmem>>, %arg10: memref<8x128xf32, #tpu.memory_space<vmem>>) attributes {dimension_semantics = [#tpu.dimension_semantics<parallel>], iteration_bounds = array<i64: 1>, scalar_prefetch = 0 : i64, scratch_operands = 0 : i64, tpu.core_type = #tpu.core_type<tc>, window_params = [{transform_indices = @transform_0, window_bounds = array<i64: 8, 400>}, {pipeline_mode = #tpu.pipeline_mode<synchronous>, transform_indices = @transform_1, window_bounds = array<i64: 400, 512>}, {pipeline_mode = #tpu.pipeline_mode<synchronous>, transform_indices = @transform_2, window_bounds = array<i64: 1, 512>}, {pipeline_mode = #tpu.pipeline_mode<synchronous>, transform_indices = @transform_3, window_bounds = array<i64: 512, 64>}, {pipeline_mode = #tpu.pipeline_mode<synchronous>, transform_indices = @transform_4, window_bounds = array<i64: 1, 64>}, {pipeline_mode = #tpu.pipeline_mode<synchronous>, transform_indices = @transform_5, window_bounds = array<i64: 64, 32>}, {pipeline_mode = #tpu.pipeline_mode<synchronous>, transform_indices = @transform_6, window_bounds = array<i64: 1, 32>}, {pipeline_mode = #tpu.pipeline_mode<synchronous>, transform_indices = @transform_7, window_bounds = array<i64: 32, 128>}, {pipeline_mode = #tpu.pipeline_mode<synchronous>, transform_indices = @transform_8, window_bounds = array<i64: 1, 128>}, {transform_indices = @transform_9, window_bounds = array<i64: 8, 128>}]} {
    %c0 = arith.constant 0 : index
    %c0_0 = arith.constant 0 : index
    %0 = vector.load %arg1[%c0, %c0_0] : memref<8x400xbf16, #tpu.memory_space<vmem>>, vector<8x400xbf16>
    %c0_1 = arith.constant 0 : index
    %c0_2 = arith.constant 0 : index
    %1 = vector.load %arg2[%c0_1, %c0_2] : memref<400x512xbf16, #tpu.memory_space<vmem>>, vector<400x512xbf16>
    %cst = arith.constant dense<0.000000e+00> : vector<8x512xf32>
    %2 = tpu.matmul %0, %1, %cst {dimension_numbers = #tpu.dot_dimension_numbers<[1], [0], [0], [1], [0, 0, 1, 1], [], []>} : vector<8x400xbf16>, vector<400x512xbf16>, vector<8x512xf32> -> vector<8x512xf32>
    %c0_3 = arith.constant 0 : index
    %c0_4 = arith.constant 0 : index
    %3 = vector.load %arg3[%c0_3, %c0_4] : memref<1x512xf32, #tpu.memory_space<vmem>>, vector<1x512xf32>
    %4 = vector.broadcast %3 : vector<1x512xf32> to vector<8x512xf32>
    %5 = arith.addf %2, %4 : vector<8x512xf32>
    %cst_5 = arith.constant 0.000000e+00 : f32
    %6 = vector.broadcast %cst_5 : f32 to vector<8x512xf32>
    %7 = arith.maximumf %5, %6 : vector<8x512xf32>
    %8 = arith.truncf %7 : vector<8x512xf32> to vector<8x512xbf16>
    %c0_6 = arith.constant 0 : index
    %c0_7 = arith.constant 0 : index
    %9 = vector.load %arg4[%c0_6, %c0_7] : memref<512x64xbf16, #tpu.memory_space<vmem>>, vector<512x64xbf16>
    %cst_8 = arith.constant dense<0.000000e+00> : vector<8x64xf32>
    %10 = tpu.matmul %8, %9, %cst_8 {dimension_numbers = #tpu.dot_dimension_numbers<[1], [0], [0], [1], [0, 0, 1, 1], [], []>} : vector<8x512xbf16>, vector<512x64xbf16>, vector<8x64xf32> -> vector<8x64xf32>
    %c0_9 = arith.constant 0 : index
    %c0_10 = arith.constant 0 : index
    %11 = vector.load %arg5[%c0_9, %c0_10] : memref<1x64xf32, #tpu.memory_space<vmem>>, vector<1x64xf32>
    %12 = vector.broadcast %11 : vector<1x64xf32> to vector<8x64xf32>
    %13 = arith.addf %10, %12 : vector<8x64xf32>
    %cst_11 = arith.constant 0.000000e+00 : f32
    %14 = vector.broadcast %cst_11 : f32 to vector<8x64xf32>
    %15 = arith.maximumf %13, %14 : vector<8x64xf32>
    %16 = arith.truncf %15 : vector<8x64xf32> to vector<8x64xbf16>
    %c0_12 = arith.constant 0 : index
    %c0_13 = arith.constant 0 : index
    %17 = vector.load %arg6[%c0_12, %c0_13] : memref<64x32xbf16, #tpu.memory_space<vmem>>, vector<64x32xbf16>
    %cst_14 = arith.constant dense<0.000000e+00> : vector<8x32xf32>
    %18 = tpu.matmul %16, %17, %cst_14 {dimension_numbers = #tpu.dot_dimension_numbers<[1], [0], [0], [1], [0, 0, 1, 1], [], []>} : vector<8x64xbf16>, vector<64x32xbf16>, vector<8x32xf32> -> vector<8x32xf32>
    %c0_15 = arith.constant 0 : index
    %c0_16 = arith.constant 0 : index
    %19 = vector.load %arg7[%c0_15, %c0_16] : memref<1x32xf32, #tpu.memory_space<vmem>>, vector<1x32xf32>
    %20 = vector.broadcast %19 : vector<1x32xf32> to vector<8x32xf32>
    %21 = arith.addf %18, %20 : vector<8x32xf32>
    %cst_17 = arith.constant 0.000000e+00 : f32
    %22 = vector.broadcast %cst_17 : f32 to vector<8x32xf32>
    %23 = arith.maximumf %21, %22 : vector<8x32xf32>
    %24 = arith.truncf %23 : vector<8x32xf32> to vector<8x32xbf16>
    %c0_18 = arith.constant 0 : index
    %c0_19 = arith.constant 0 : index
    %25 = vector.load %arg8[%c0_18, %c0_19] : memref<32x128xbf16, #tpu.memory_space<vmem>>, vector<32x128xbf16>
    %cst_20 = arith.constant dense<0.000000e+00> : vector<8x128xf32>
    %26 = tpu.matmul %24, %25, %cst_20 {dimension_numbers = #tpu.dot_dimension_numbers<[1], [0], [0], [1], [0, 0, 1, 1], [], []>} : vector<8x32xbf16>, vector<32x128xbf16>, vector<8x128xf32> -> vector<8x128xf32>
    %c0_21 = arith.constant 0 : index
    %c0_22 = arith.constant 0 : index
    %27 = vector.load %arg9[%c0_21, %c0_22] : memref<1x128xf32, #tpu.memory_space<vmem>>, vector<1x128xf32>
    %28 = vector.broadcast %27 : vector<1x128xf32> to vector<8x128xf32>
    %29 = arith.addf %26, %28 : vector<8x128xf32>
    %cst_23 = arith.constant dense<0xFF800000> : vector<8xf32>
    %30 = vector.multi_reduction <maximumf>, %29, %cst_23 [1] : vector<8x128xf32> to vector<8xf32>
    %31 = vector.shape_cast %30 : vector<8xf32> to vector<8x1xf32>
    %32 = vector.broadcast %31 : vector<8x1xf32> to vector<8x128xf32>
    %33 = arith.subf %29, %32 : vector<8x128xf32>
    %34 = math.exp %33 : vector<8x128xf32>
    %cst_24 = arith.constant dense<0.000000e+00> : vector<8xf32>
    %35 = vector.multi_reduction <add>, %34, %cst_24 [1] : vector<8x128xf32> to vector<8xf32>
    %36 = vector.shape_cast %35 : vector<8xf32> to vector<8x1xf32>
    %37 = vector.broadcast %36 : vector<8x1xf32> to vector<8x128xf32>
    %38 = arith.divf %34, %37 : vector<8x128xf32>
    %c0_25 = arith.constant 0 : index
    %c0_26 = arith.constant 0 : index
    %39 = vector.load %arg10[%c0_25, %c0_26] : memref<8x128xf32, #tpu.memory_space<vmem>>, vector<8x128xf32>
    tpu.vector_store %arg10[%c0_25, %c0_26], %38 {strides = array<i32>} : memref<8x128xf32, #tpu.memory_space<vmem>>, vector<8x128xf32>,
    return
  }
  func.func @transform_0(%arg0: i32) -> (i32, i32) {
    %c0_i32 = arith.constant 0 : i32
    %c0_i32_0 = arith.constant 0 : i32
    return %arg0, %c0_i32 : i32, i32
  }
  func.func @transform_1(%arg0: i32) -> (i32, i32) {
    %c0_i32 = arith.constant 0 : i32
    %c0_i32_0 = arith.constant 0 : i32
    %c0_i32_1 = arith.constant 0 : i32
    return %c0_i32, %c0_i32_0 : i32, i32
  }
  func.func @transform_2(%arg0: i32) -> (i32, i32) {
    %c0_i32 = arith.constant 0 : i32
    %c0_i32_0 = arith.constant 0 : i32
    %c0_i32_1 = arith.constant 0 : i32
    return %c0_i32, %c0_i32_0 : i32, i32
  }
  func.func @transform_3(%arg0: i32) -> (i32, i32) {
    %c0_i32 = arith.constant 0 : i32
    %c0_i32_0 = arith.constant 0 : i32
    %c0_i32_1 = arith.constant 0 : i32
    return %c0_i32, %c0_i32_0 : i32, i32
  }
  func.func @transform_4(%arg0: i32) -> (i32, i32) {
    %c0_i32 = arith.constant 0 : i32
    %c0_i32_0 = arith.constant 0 : i32
    %c0_i32_1 = arith.constant 0 : i32
    return %c0_i32, %c0_i32_0 : i32, i32
  }
  func.func @transform_5(%arg0: i32) -> (i32, i32) {
    %c0_i32 = arith.constant 0 : i32
    %c0_i32_0 = arith.constant 0 : i32
    %c0_i32_1 = arith.constant 0 : i32
    return %c0_i32, %c0_i32_0 : i32, i32
  }
  func.func @transform_6(%arg0: i32) -> (i32, i32) {
    %c0_i32 = arith.constant 0 : i32
    %c0_i32_0 = arith.constant 0 : i32
    %c0_i32_1 = arith.constant 0 : i32
    return %c0_i32, %c0_i32_0 : i32, i32
  }
  func.func @transform_7(%arg0: i32) -> (i32, i32) {
    %c0_i32 = arith.constant 0 : i32
    %c0_i32_0 = arith.constant 0 : i32
    %c0_i32_1 = arith.constant 0 : i32
    return %c0_i32, %c0_i32_0 : i32, i32
  }
  func.func @transform_8(%arg0: i32) -> (i32, i32) {
    %c0_i32 = arith.constant 0 : i32
    %c0_i32_0 = arith.constant 0 : i32
    %c0_i32_1 = arith.constant 0 : i32
    return %c0_i32, %c0_i32_0 : i32, i32
  }
  func.func @transform_9(%arg0: i32) -> (i32, i32) {
    %c0_i32 = arith.constant 0 : i32
    %c0_i32_0 = arith.constant 0 : i32
    return %arg0, %c0_i32 : i32, i32
  }
}

</mosaic_0001>

<bundles_post_ra>
// kernel: actor_forward.1
= control target key start
LH: loop header
LB: loop body
LE: loop exit
PB: predicated region body
PF: predicated region fallthrough
CT: control target
= control target key end

     0   :  { %14 = vsyncpa [#allocation3], 0  ;;  %s1830_s30 = smov [#allocation2]   ;;  %s2038_s0 = inlined_call_operand.vmem [shape: bf16[8,400], index: 0, kind: input, shape index: {}]   ;;  %s2039_s1 = inlined_call_operand.hbm [shape: bf16[400,512], index: 1, kind: input, shape index: {}]   ;;  %s2040_s2 = inlined_call_operand.vmem [shape: f32[1,512], index: 2, kind: input, shape index: {}]   ;;  %s2041_s3 = inlined_call_operand.vmem [shape: bf16[512,64], index: 3, kind: input, shape index: {}]   ;;  %s2042_s4 = inlined_call_operand.vmem [shape: f32[1,64], index: 4, kind: input, shape index: {}]   ;;  %s2043_s5 = inlined_call_operand.vmem [shape: bf16[64,32], index: 5, kind: input, shape index: {}]   ;;  %s2044_s6 = inlined_call_operand.vmem [shape: f32[1,32], index: 6, kind: input, shape index: {}]   ;;  %s2045_s7 = inlined_call_operand.vmem [shape: bf16[32,128], index: 7, kind: input, shape index: {}]   ;;  %s2046_s8 = inlined_call_operand.vmem [shape: f32[1,128], index: 8, kind: input, shape index: {}]   ;;  %s2047_s9 = inlined_call_operand.vmem [shape: f32[8,128], index: 9, kind: output, shape index: {}]  }
   0x1   :  { %s22_s10 = sshll.u32 %s1830_s30, 4  ;;  %s1806_s13 = scalar_lea.hbm %s2039_s1, 12800  ;;  %s23_s10 = int_to_ptr.vmem [resolvable:$true] %s22_s10 }
   0x2   :  { %p1807_p0 = scmp.ne.s32.totalorder %s2039_s1, %s1806_s13  ;;  %p1810_p1 = scmp.lt.u32.totalorder %s1806_s13, %s2039_s1 }
   0x4   :  { %p1812_p2 = pnand %p1810_p1, %p1807_p0 }
   0x6   :  { %1815 = shalt.err (!%p1812_p2)
}
   0x7   :  { %s1816_s18 = scalar_lea.vmem %s23_s10, 12800  ;;  %p1821_p4 = scmp.lt.s32.totalorder %s23_s10, %s23_s10 }
   0x8   :  { %p1817_p3 = scmp.ne.s32.totalorder %s23_s10, %s1816_s18  ;;  %p1822_p5 = scmp.lt.s32.totalorder %s1816_s18, %s1816_s18 }
   0xa   :  { %p1823_p6 = por %p1822_p5, %p1821_p4 }
   0xc   :  { %p1824_p7 = pnand %p1823_p6, %p1817_p3 }
   0xe   :  { %1827 = shalt.err (!%p1824_p7)
}
   0xf   :  { %s1831_s19 = smov 256   ;;  %s1832_s20 = smov 16  }
  0x10   :  { %28 = dma.hbm_to_vmem [thread:$0]  %s2039_s1, 12800, %s23_s10, [#allocation3], %s1831_s19, %s1831_s19, %s1832_s20  }
  0x11   :  { %1828 = dma.done.wait [#allocation3], 12800  }
  0x12   :  { %1829 = vsyncadd [#allocation3], 4294954496  ;;  %v1610_v0 = vld [vmem:[#allocation2 + $0x4] ss:$16 sps:$4 sm:$0xff]   ;;  %v1612_v1 = vld [vmem:[#allocation2 + $0xc] ss:$16 sps:$4 sm:$0xff]  }
  0x13   :  { %688 = vmatprep.subr.bf16.mxu0 %v1610_v0  ;;  %v1614_v2 = vld [vmem:[#allocation2] ss:$16 sps:$4 sm:$0xff]   ;;  %v1615_v3 = vld [vmem:[#allocation2 + $0x8] ss:$16 sps:$4 sm:$0xff]   ;;  %770 = vmatprep.subr.bf16.mxu1 %v1612_v1  ;;  %v1616_v4 = vld [vmem:[#allocation2 + $0x24] ss:$16 sps:$4 sm:$0xff]  }
  0x14   :  { %689 = vmatpush1.bf16.msra.mxu0 %v1614_v2  ;;  %771 = vmatpush1.bf16.msra.mxu1 %v1615_v3  ;;  %v1618_v5 = vld [vmem:[#allocation2 + $0x2c] ss:$16 sps:$4 sm:$0xff]   ;;  %v1620_v6 = vld [vmem:[#allocation2 + $0x20] ss:$16 sps:$4 sm:$0xff]   ;;  %v1621_v7 = vld [vmem:[#allocation2 + $0x28] ss:$16 sps:$4 sm:$0xff]  }
  0x15   :  { %690 = vmatprep.subr.bf16.mxu0 %v1616_v4  ;;  %772 = vmatprep.subr.bf16.mxu1 %v1618_v5  ;;  %v1622_v8 = vld [vmem:[#allocation2 + $0x44] ss:$16 sps:$4 sm:$0xff]   ;;  %v1624_v9 = vld [vmem:[#allocation2 + $0x4c] ss:$16 sps:$4 sm:$0xff]   ;;  %v1626_v10 = vld [vmem:[#allocation2 + $0x40] ss:$16 sps:$4 sm:$0xff]  }
  0x16   :  { %v1627_v11 = vld [vmem:[#allocation2 + $0x48] ss:$16 sps:$4 sm:$0xff]   ;;  %v1628_v12 = vld [vmem:[#allocation2 + $0x64] ss:$16 sps:$4 sm:$0xff]   ;;  %v1630_v13 = vld [vmem:[#allocation2 + $0x6c] ss:$16 sps:$4 sm:$0xff]  }
  0x17   :  { %v1632_v14 = vld [vmem:[#allocation2 + $0x60] ss:$16 sps:$4 sm:$0xff]   ;;  %v1633_v15 = vld [vmem:[#allocation2 + $0x68] ss:$16 sps:$4 sm:$0xff]   ;;  %v1634_v16 = vld [vmem:[#allocation2 + $0x84] ss:$16 sps:$4 sm:$0xff]  }
  0x18   :  { %691 = vmatpush1.bf16.msra.mxu0 %v1620_v6  ;;  %773 = vmatpush1.bf16.msra.mxu1 %v1621_v7  ;;  %v1636_v17 = vld [vmem:[#allocation2 + $0x8c] ss:$16 sps:$4 sm:$0xff]   ;;  %v1638_v18 = vld [vmem:[#allocation2 + $0x80] ss:$16 sps:$4 sm:$0xff]   ;;  %v1639_v19 = vld [vmem:[#allocation2 + $0x88] ss:$16 sps:$4 sm:$0xff]  }
  0x19   :  { %692 = vmatprep.subr.bf16.mxu0 %v1622_v8  ;;  %774 = vmatprep.subr.bf16.mxu1 %v1624_v9  ;;  %v1640_v20 = vld [vmem:[#allocation2 + $0xa4] ss:$16 sps:$4 sm:$0xff]   ;;  %v1642_v21 = vld [vmem:[#allocation2 + $0xac] ss:$16 sps:$4 sm:$0xff]   ;;  %v1644_v22 = vld [vmem:[#allocation2 + $0xa0] ss:$16 sps:$4 sm:$0xff]  }
  0x1a   :  { %v1645_v23 = vld [vmem:[#allocation2 + $0xa8] ss:$16 sps:$4 sm:$0xff]   ;;  %v1646_v24 = vld [vmem:[#allocation2 + $0xc4] ss:$16 sps:$4 sm:$0xff]   ;;  %v1648_v25 = vld [vmem:[#allocation2 + $0xcc] ss:$16 sps:$4 sm:$0xff]  }
  0x1b   :  { %v1650_v26 = vld [vmem:[#allocation2 + $0xc0] ss:$16 sps:$4 sm:$0xff]   ;;  %v1651_v27 = vld [vmem:[#allocation2 + $0xc8] ss:$16 sps:$4 sm:$0xff]   ;;  %v1652_v28 = vld [vmem:[#allocation2 + $0xe4] ss:$16 sps:$4 sm:$0xff]  }
  0x1c   :  { %693 = vmatpush1.bf16.msra.mxu0 %v1626_v10  ;;  %775 = vmatpush1.bf16.msra.mxu1 %v1627_v11  ;;  %v1654_v29 = vld [vmem:[#allocation2 + $0xec] ss:$16 sps:$4 sm:$0xff]   ;;  %v1656_v30 = vld [vmem:[#allocation2 + $0xe0] ss:$16 sps:$4 sm:$0xff]   ;;  %v1657_v31 = vld [vmem:[#allocation2 + $0xe8] ss:$16 sps:$4 sm:$0xff]  }
  0x1d   :  { %694 = vmatprep.subr.bf16.mxu0 %v1628_v12  ;;  %776 = vmatprep.subr.bf16.mxu1 %v1630_v13  ;;  %v1658_v32 = vld [vmem:[#allocation2 + $0x104] ss:$16 sps:$4 sm:$0xff]   ;;  %v1660_v33 = vld [vmem:[#allocation2 + $0x10c] ss:$16 sps:$4 sm:$0xff]   ;;  %v1662_v34 = vld [vmem:[#allocation2 + $0x100] ss:$16 sps:$4 sm:$0xff]  }
  0x1e   :  { %v1663_v35 = vld [vmem:[#allocation2 + $0x108] ss:$16 sps:$4 sm:$0xff]   ;;  %v1664_v36 = vld [vmem:[#allocation2 + $0x124] ss:$16 sps:$4 sm:$0xff]   ;;  %v1666_v37 = vld [vmem:[#allocation2 + $0x12c] ss:$16 sps:$4 sm:$0xff]  }
  0x1f   :  { %v1668_v38 = vld [vmem:[#allocation2 + $0x120] ss:$16 sps:$4 sm:$0xff]   ;;  %v1669_v39 = vld [vmem:[#allocation2 + $0x128] ss:$16 sps:$4 sm:$0xff]   ;;  %v1670_v40 = vld [vmem:[#allocation2 + $0x144] ss:$16 sps:$4 sm:$0xff]  }
  0x20   :  { %695 = vmatpush1.bf16.msra.mxu0 %v1632_v14  ;;  %777 = vmatpush1.bf16.msra.mxu1 %v1633_v15  ;;  %v1672_v41 = vld [vmem:[#allocation2 + $0x14c] ss:$16 sps:$4 sm:$0xff]   ;;  %v1674_v42 = vld [vmem:[#allocation2 + $0x140] ss:$16 sps:$4 sm:$0xff]   ;;  %v1675_v43 = vld [vmem:[#allocation2 + $0x148] ss:$16 sps:$4 sm:$0xff]  }
  0x21   :  { %696 = vmatprep.subr.bf16.mxu0 %v1634_v16  ;;  %778 = vmatprep.subr.bf16.mxu1 %v1636_v17  ;;  %v1676_v44 = vld [vmem:[#allocation2 + $0x164] ss:$16 sps:$4 sm:$0xff]   ;;  %v1678_v45 = vld [vmem:[#allocation2 + $0x16c] ss:$16 sps:$4 sm:$0xff]   ;;  %v1680_v47 = vld [vmem:[#allocation2 + $0x160] ss:$16 sps:$4 sm:$0xff]  }
  0x22   :  { %v47_v46 = vld [vmem:[%s2038_s0] sm:$0xff]  ;;  %v1681_v49 = vld [vmem:[#allocation2 + $0x168] ss:$16 sps:$4 sm:$0xff]   ;;  %v1684_v51 = vld [vmem:[#allocation2 + $0x18c] ss:$16 sps:$4 sm:$0xff]   ;;  %vm684_vm0 = vcmask 130048  }
  0x23   :  { %v1373_v48 = vcombine.high %v47_v46, %v47_v46  ;;  %v1682_v50 = vld [vmem:[#allocation2 + $0x184] ss:$16 sps:$4 sm:$0xff]   ;;  %v1686_v52 = vld [vmem:[#allocation2 + $0x180] ss:$16 sps:$4 sm:$0xff]   ;;  %v1687_v53 = vld [vmem:[#allocation2 + $0x188] ss:$16 sps:$4 sm:$0xff]   ;;  %v1372_v4 = vcombine.low %v47_v46, %v47_v46 }
  0x24   :  { %697 = vmatpush1.bf16.msra.mxu0 %v1638_v18  ;;  %779 = vmatpush1.bf16.msra.mxu1 %v1639_v19  ;;  %v1688_v54 = vld [vmem:[#allocation2 + $0x1a4] ss:$16 sps:$4 sm:$0xff]   ;;  %v1690_v55 = vld [vmem:[#allocation2 + $0x1ac] ss:$16 sps:$4 sm:$0xff]   ;;  %v1692_v56 = vld [vmem:[#allocation2 + $0x1a0] ss:$16 sps:$4 sm:$0xff]  }
  0x25   :  { %698 = vmatprep.subr.bf16.mxu0 %v1640_v20  ;;  %780 = vmatprep.subr.bf16.mxu1 %v1642_v21  ;;  %v1693_v57 = vld [vmem:[#allocation2 + $0x1a8] ss:$16 sps:$4 sm:$0xff]   ;;  %v1694_v58 = vld [vmem:[#allocation2 + $0x1c4] ss:$16 sps:$4 sm:$0xff]   ;;  %v1696_v59 = vld [vmem:[#allocation2 + $0x1cc] ss:$16 sps:$4 sm:$0xff]  }
  0x26   :  { %720 = vmatprep.mubr.bf16.mxu0 %v1373_v48  ;;  %802 = vmatprep.mubr.bf16.mxu1 %v1373_v48  ;;  %v1698_v60 = vld [vmem:[#allocation2 + $0x1c0] ss:$16 sps:$4 sm:$0xff]   ;;  %v1699_v61 = vld [vmem:[#allocation2 + $0x1c8] ss:$16 sps:$4 sm:$0xff]   ;;  %v1700_v62 = vld [vmem:[#allocation2 + $0x1e4] ss:$16 sps:$4 sm:$0xff]  }
  0x27   :  { %v1702_v63 = vld [vmem:[#allocation2 + $0x1ec] ss:$16 sps:$4 sm:$0xff]   ;;  %v1704_v0 = vld [vmem:[#allocation2 + $0x1e0] ss:$16 sps:$4 sm:$0xff]   ;;  %v1705_v1 = vld [vmem:[#allocation2 + $0x1e8] ss:$16 sps:$4 sm:$0xff]  }
  0x28   :  { %699 = vmatpush1.bf16.msra.mxu0 %v1644_v22  ;;  %781 = vmatpush1.bf16.msra.mxu1 %v1645_v23  ;;  %v1710_v2 = vld [vmem:[#allocation2 + $0x204] ss:$16 sps:$4 sm:$0xff]   ;;  %v1713_v3 = vld [vmem:[#allocation2 + $0x20c] ss:$16 sps:$4 sm:$0xff]   ;;  %v1708_v5 = vld [vmem:[#allocation2 + $0x200] ss:$16 sps:$4 sm:$0xff]  }
  0x29   :  { %700 = vmatprep.subr.bf16.mxu0 %v1646_v24  ;;  %782 = vmatprep.subr.bf16.mxu1 %v1648_v25  ;;  %v1711_v6 = vld [vmem:[#allocation2 + $0x208] ss:$16 sps:$4 sm:$0xff]   ;;  %v1716_v7 = vld [vmem:[#allocation2 + $0x224] ss:$16 sps:$4 sm:$0xff]   ;;  %v1719_v8 = vld [vmem:[#allocation2 + $0x22c] ss:$16 sps:$4 sm:$0xff]  }
  0x2a   :  { %v1714_v9 = vld [vmem:[#allocation2 + $0x220] ss:$16 sps:$4 sm:$0xff]   ;;  %v1717_v10 = vld [vmem:[#allocation2 + $0x228] ss:$16 sps:$4 sm:$0xff]   ;;  %v1722_v12 = vld [vmem:[#allocation2 + $0x244] ss:$16 sps:$4 sm:$0xff]  }
  0x2b   :  { %v1903_v11 = vld [vmem:[%s2038_s0 + $0x8] sm:$0xff]  ;;  %v1720_v15 = vld [vmem:[#allocation2 + $0x240] ss:$16 sps:$4 sm:$0xff]   ;;  %v1728_v17 = vld [vmem:[#allocation2 + $0x264] ss:$16 sps:$4 sm:$0xff]   ;;  %vm1834_vm1 = vmmov 0  }
  0x2c   :  { %701 = vmatpush1.bf16.msra.mxu0 %v1650_v26  ;;  %783 = vmatpush1.bf16.msra.mxu1 %v1651_v27  ;;  %v1375_v13 = vcombine.high %v1903_v11, %v1903_v11  ;;  %v1725_v14 = vld [vmem:[#allocation2 + $0x24c] ss:$16 sps:$4 sm:$0xff]   ;;  %v1723_v16 = vld [vmem:[#allocation2 + $0x248] ss:$16 sps:$4 sm:$0xff]   ;;  %v1726_v19 = vld [vmem:[#allocation2 + $0x260] ss:$16 sps:$4 sm:$0xff]  }
  0x2d   :  { %702 = vmatprep.subr.bf16.mxu0 %v1652_v28  ;;  %784 = vmatprep.subr.bf16.mxu1 %v1654_v29  ;;  %v1731_v18 = vld [vmem:[#allocation2 + $0x26c] ss:$16 sps:$4 sm:$0xff]   ;;  %v1729_v20 = vld [vmem:[#allocation2 + $0x268] ss:$16 sps:$4 sm:$0xff]   ;;  %v1734_v21 = vld [vmem:[#allocation2 + $0x284] ss:$16 sps:$4 sm:$0xff]  }
  0x2e   :  { %v1737_v22 = vld [vmem:[#allocation2 + $0x28c] ss:$16 sps:$4 sm:$0xff]   ;;  %v1732_v23 = vld [vmem:[#allocation2 + $0x280] ss:$16 sps:$4 sm:$0xff]   ;;  %v1735_v24 = vld [vmem:[#allocation2 + $0x288] ss:$16 sps:$4 sm:$0xff]  }
  0x2f   :  { %v1740_v25 = vld [vmem:[#allocation2 + $0x2a4] ss:$16 sps:$4 sm:$0xff]   ;;  %v1743_v26 = vld [vmem:[#allocation2 + $0x2ac] ss:$16 sps:$4 sm:$0xff]   ;;  %v1738_v27 = vld [vmem:[#allocation2 + $0x2a0] ss:$16 sps:$4 sm:$0xff]  }
  0x30   :  { %703 = vmatpush1.bf16.msra.mxu0 %v1656_v30  ;;  %785 = vmatpush1.bf16.msra.mxu1 %v1657_v31  ;;  %v1741_v28 = vld [vmem:[#allocation2 + $0x2a8] ss:$16 sps:$4 sm:$0xff]   ;;  %v1746_v29 = vld [vmem:[#allocation2 + $0x2c4] ss:$16 sps:$4 sm:$0xff]   ;;  %v1749_v30 = vld [vmem:[#allocation2 + $0x2cc] ss:$16 sps:$4 sm:$0xff]  }
  0x31   :  { %704 = vmatprep.subr.bf16.mxu0 %v1658_v32  ;;  %786 = vmatprep.subr.bf16.mxu1 %v1660_v33  ;;  %v1744_v31 = vld [vmem:[#allocation2 + $0x2c0] ss:$16 sps:$4 sm:$0xff]   ;;  %v1747_v32 = vld [vmem:[#allocation2 + $0x2c8] ss:$16 sps:$4 sm:$0xff]   ;;  %v1752_v33 = vld [vmem:[#allocation2 + $0x2e4] ss:$16 sps:$4 sm:$0xff]  }
  0x32   :  { %v1768_v46 = vld [vmem:[%s2041_s3 + $0x48] sm:$0xff]   ;;  %vm1244_vm2 = vcmask 523264   ;;  %vm1313_vm3 = vcmask 261120  }
  0x33   :  { %v1770_v48 = vld [vmem:[%s2041_s3 + $0x8] sm:$0xff]  }
  0x34   :  { %705 = vmatpush1.bf16.msra.mxu0 %v1662_v34  ;;  %787 = vmatpush1.bf16.msra.mxu1 %v1663_v35  ;;  %v1755_v34 = vld [vmem:[#allocation2 + $0x2ec] ss:$16 sps:$4 sm:$0xff]   ;;  %v1750_v35 = vld [vmem:[#allocation2 + $0x2e0] ss:$16 sps:$4 sm:$0xff]  }
  0x35   :  { %706 = vmatprep.subr.bf16.mxu0 %v1664_v36  ;;  %788 = vmatprep.subr.bf16.mxu1 %v1666_v37  ;;  %v1753_v36 = vld [vmem:[#allocation2 + $0x2e8] ss:$16 sps:$4 sm:$0xff]   ;;  %v1758_v37 = vld [vmem:[#allocation2 + $0x304] ss:$16 sps:$4 sm:$0xff]  }
  0x38   :  { %707 = vmatpush1.bf16.msra.mxu0 %v1668_v38  ;;  %789 = vmatpush1.bf16.msra.mxu1 %v1669_v39  ;;  %v1761_v38 = vld [vmem:[#allocation2 + $0x30c] ss:$16 sps:$4 sm:$0xff]   ;;  %v1756_v39 = vld [vmem:[#allocation2 + $0x300] ss:$16 sps:$4 sm:$0xff]  }
  0x39   :  { %708 = vmatprep.subr.bf16.mxu0 %v1670_v40  ;;  %790 = vmatprep.subr.bf16.mxu1 %v1672_v41  ;;  %v1759_v40 = vld [vmem:[#allocation2 + $0x308] ss:$16 sps:$4 sm:$0xff]   ;;  %v1764_v41 = vld [vmem:[%s2041_s3 + $0x40] sm:$0xff]  }
  0x3c   :  { %709 = vmatpush1.bf16.msra.mxu0 %v1674_v42  ;;  %791 = vmatpush1.bf16.msra.mxu1 %v1675_v43  ;;  %v1765_v42 = vld [vmem:[%s2041_s3 + $0xc0] sm:$0xff]  }
  0x3d   :  { %710 = vmatprep.subr.bf16.mxu0 %v1676_v44  ;;  %792 = vmatprep.subr.bf16.mxu1 %v1678_v45  ;;  %v1766_v43 = vld [vmem:[%s2041_s3] sm:$0xff]   ;;  %v1374_v45 = vcombine.low %v1903_v11, %v1903_v11  ;;  %v151_v11 = vlaneseq }
  0x3e   :  { %v1767_v44 = vld [vmem:[%s2041_s3 + $0x80] sm:$0xff]  }
  0x40   :  { %711 = vmatpush1.bf16.msra.mxu0 %v1680_v47  ;;  %793 = vmatpush1.bf16.msra.mxu1 %v1681_v49  ;;  %v1769_v47 = vld [vmem:[%s2041_s3 + $0xc8] sm:$0xff]  }
  0x41   :  { %712 = vmatprep.subr.bf16.mxu0 %v1682_v50  ;;  %794 = vmatprep.subr.bf16.mxu1 %v1684_v51  ;;  %v1771_v49 = vld [vmem:[%s2041_s3 + $0x88] sm:$0xff]   ;;  %v1772_v50 = vld [vmem:[%s2041_s3 + $0x50] sm:$0xff]  }
  0x42   :  { %v1773_v51 = vld [vmem:[%s2041_s3 + $0xd0] sm:$0xff]  }
  0x44   :  { %713 = vmatpush1.bf16.msra.mxu0 %v1686_v52  ;;  %795 = vmatpush1.bf16.msra.mxu1 %v1687_v53  ;;  %v1774_v52 = vld [vmem:[%s2041_s3 + $0x10] sm:$0xff]  }
  0x45   :  { %714 = vmatprep.subr.bf16.mxu0 %v1688_v54  ;;  %796 = vmatprep.subr.bf16.mxu1 %v1690_v55  ;;  %v1775_v53 = vld [vmem:[%s2041_s3 + $0x90] sm:$0xff]   ;;  %v1776_v54 = vld [vmem:[%s2041_s3 + $0x58] sm:$0xff]  }
  0x46   :  { %v1777_v55 = vld [vmem:[%s2041_s3 + $0xd8] sm:$0xff]  }
  0x48   :  { %715 = vmatpush1.bf16.msra.mxu0 %v1692_v56  ;;  %797 = vmatpush1.bf16.msra.mxu1 %v1693_v57  ;;  %v1778_v56 = vld [vmem:[%s2041_s3 + $0x18] sm:$0xff]  }
  0x49   :  { %716 = vmatprep.subr.bf16.mxu0 %v1694_v58  ;;  %798 = vmatprep.subr.bf16.mxu1 %v1696_v59  ;;  %v1779_v57 = vld [vmem:[%s2041_s3 + $0x98] sm:$0xff]   ;;  %v1780_v58 = vld [vmem:[%s2041_s3 + $0x60] sm:$0xff]  }
  0x4a   :  { %v1781_v59 = vld [vmem:[%s2041_s3 + $0xe0] sm:$0xff]  }
  0x4c   :  { %717 = vmatpush1.bf16.msra.mxu0 %v1698_v60  ;;  %799 = vmatpush1.bf16.msra.mxu1 %v1699_v61  ;;  %v1782_v60 = vld [vmem:[%s2041_s3 + $0x20] sm:$0xff]  }
  0x4d   :  { %718 = vmatprep.subr.bf16.mxu0 %v1700_v62  ;;  %800 = vmatprep.subr.bf16.mxu1 %v1702_v63  ;;  %v1783_v61 = vld [vmem:[%s2041_s3 + $0xa0] sm:$0xff]   ;;  %v1784_v62 = vld [vmem:[%s2041_s3 + $0x68] sm:$0xff]  }
  0x4e   :  { %v1785_v63 = vld [vmem:[%s2041_s3 + $0xe8] sm:$0xff]  }
  0x50   :  { %719 = vmatpush1.bf16.msra.mxu0 %v1704_v0  ;;  %801 = vmatpush1.bf16.msra.mxu1 %v1705_v1  ;;  %v1786_v0 = vld [vmem:[%s2041_s3 + $0x28] sm:$0xff]  }
  0x51   :  { %729 = vmatprep.subr.bf16.mxu0 %v1710_v2  ;;  %811 = vmatprep.subr.bf16.mxu1 %v1713_v3  ;;  %v1787_v1 = vld [vmem:[%s2041_s3 + $0xa8] sm:$0xff]   ;;  %v1788_v2 = vld [vmem:[%s2041_s3 + $0x70] sm:$0xff]  }
  0x52   :  { %v1789_v3 = vld [vmem:[%s2041_s3 + $0xf0] sm:$0xff]  }
  0x53   :  { %721 = vmatmul.mubr.bf16.vlgmr.msra.gmra.mrb[0].mxu0 %v1372_v4  ;;  %803 = vmatmul.mubr.bf16.vlgmr.msra.gmra.mrb[0].mxu1 %v1372_v4  ;;  %v1790_v4 = vld [vmem:[%s2041_s3 + $0x30] sm:$0xff]  }
  0x54   :  { %730 = vmatpush1.bf16.msra.mxu0 %v1708_v5  ;;  %812 = vmatpush1.bf16.msra.mxu1 %v1711_v6  ;;  %v1791_v5 = vld [vmem:[%s2041_s3 + $0xb0] sm:$0xff]   ;;  %v1792_v6 = vld [vmem:[%s2041_s3 + $0x78] sm:$0xff]  }
  0x55   :  { %731 = vmatprep.subr.bf16.mxu0 %v1716_v7  ;;  %813 = vmatprep.subr.bf16.mxu1 %v1719_v8  ;;  %v1793_v7 = vld [vmem:[%s2041_s3 + $0xf8] sm:$0xff]  }
  0x56   :  { %1476 = vmatprep.mubr.msk.bf16.mxu0 %vm684_vm0, %v1375_v13  ;;  %1477 = vmatprep.mubr.msk.bf16.mxu1 %vm684_vm0, %v1375_v13  ;;  %v1794_v8 = vld [vmem:[%s2041_s3 + $0x38] sm:$0xff]  }
  0x58   :  { %732 = vmatpush1.bf16.msra.mxu0 %v1714_v9  ;;  %814 = vmatpush1.bf16.msra.mxu1 %v1717_v10  ;;  %v1795_v9 = vld [vmem:[%s2041_s3 + $0xb8] sm:$0xff]   ;;  %v1833_v10 = vmov 0.0  }
  0x59   :  { %733 = vmatprep.subr.bf16.mxu0 %v1722_v12  ;;  %815 = vmatprep.subr.bf16.mxu1 %v1725_v14  ;;  %v152_v12 = vshrl.u32 %v151_v11, 7 }
  0x5b   :  { %v153_v13 = vsub.s32 0, %v152_v12  ;;  %v161_v14 = vsub.s32 2, %v152_v12 }
  0x5c   :  { %734 = vmatpush1.bf16.msra.mxu0 %v1720_v15  ;;  %816 = vmatpush1.bf16.msra.mxu1 %v1723_v16  ;;  %v149_v15 = vld [vmem:[%s2040_s2] sm:$0xf]  ;;  %v157_v16 = vsub.s32 1, %v152_v12 }
  0x5d   :  { %735 = vmatprep.subr.bf16.mxu0 %v1728_v17  ;;  %817 = vmatprep.subr.bf16.mxu1 %v1731_v18  ;;  %v165_v17 = vsub.s32 3, %v152_v12  ;;  %v154_v18 = vrot.slane %v149_v15, %v153_v13 }
  0x60   :  { %736 = vmatpush1.bf16.msra.mxu0 %v1726_v19  ;;  %818 = vmatpush1.bf16.msra.mxu1 %v1729_v20  ;;  %v162_v19 = vrot.slane %v149_v15, %v161_v14  ;;  %v158_v20 = vrot.slane %v149_v15, %v157_v16 }
  0x61   :  { %737 = vmatprep.subr.bf16.mxu0 %v1734_v21  ;;  %819 = vmatprep.subr.bf16.mxu1 %v1737_v22  ;;  %v166_v21 = vrot.slane %v149_v15, %v165_v17 }
  0x64   :  { %738 = vmatpush1.bf16.msra.mxu0 %v1732_v23  ;;  %820 = vmatpush1.bf16.msra.mxu1 %v1735_v24 }
  0x65   :  { %739 = vmatprep.subr.bf16.mxu0 %v1740_v25  ;;  %821 = vmatprep.subr.bf16.mxu1 %v1743_v26 }
  0x68   :  { %740 = vmatpush1.bf16.msra.mxu0 %v1738_v27  ;;  %822 = vmatpush1.bf16.msra.mxu1 %v1741_v28 }
  0x69   :  { %741 = vmatprep.subr.bf16.mxu0 %v1746_v29  ;;  %823 = vmatprep.subr.bf16.mxu1 %v1749_v30 }
  0x6c   :  { %742 = vmatpush1.bf16.msra.mxu0 %v1744_v31  ;;  %824 = vmatpush1.bf16.msra.mxu1 %v1747_v32 }
  0x6d   :  { %743 = vmatprep.subr.bf16.mxu0 %v1752_v33  ;;  %825 = vmatprep.subr.bf16.mxu1 %v1755_v34 }
  0x70   :  { %744 = vmatpush1.bf16.msra.mxu0 %v1750_v35  ;;  %826 = vmatpush1.bf16.msra.mxu1 %v1753_v36 }
  0x71   :  { %745 = vmatprep.subr.bf16.mxu0 %v1758_v37  ;;  %827 = vmatprep.subr.bf16.mxu1 %v1761_v38 }
  0x74   :  { %746 = vmatpush1.bf16.msra.mxu0 %v1756_v39  ;;  %828 = vmatpush1.bf16.msra.mxu1 %v1759_v40  ;;  %v1796_v40 = vld [vmem:[%s2043_s5] sm:$0xff]  }
  0x75   :  { %1521 = vmatprep.subr.bf16.mxu0 %v1764_v41  ;;  %1543 = vmatprep.subr.bf16.mxu1 %v1765_v42 }
  0x77   :  { %762 = vmatmul.mubr.bf16.vlgmr.msra.gmra.mrb[0].mxu0 %v1374_v45  ;;  %844 = vmatmul.mubr.bf16.vlgmr.msra.gmra.mrb[0].mxu1 %v1374_v45  ;;  %v1799_v45 = vld [vmem:[%s2043_s5 + $0x18] sm:$0xff]  }
  0x78   :  { %1522 = vmatpush3.bf16.msra.mxu0 %v1766_v43  ;;  %1544 = vmatpush3.bf16.msra.mxu1 %v1767_v44  ;;  %v1797_v43 = vld [vmem:[%s2043_s5 + $0x8] sm:$0xff]   ;;  %v1798_v44 = vld [vmem:[%s2043_s5 + $0x10] sm:$0xff]  }
  0x79   :  { %1523 = vmatprep.subr.bf16.mxu0 %v1768_v46  ;;  %1545 = vmatprep.subr.bf16.mxu1 %v1769_v47  ;;  %v1800_v46 = vld [vmem:[%s2045_s7] sm:$0xff]  }
  0x7c   :  { %1524 = vmatpush3.bf16.msra.mxu0 %v1770_v48  ;;  %1546 = vmatpush3.bf16.msra.mxu1 %v1771_v49  ;;  %v1478_v49 = vld [vmem:[%s2042_s4] ss:$0 sm:$0xff] }
  0x7d   :  { %1525 = vmatprep.subr.bf16.mxu0 %v1772_v50  ;;  %1547 = vmatprep.subr.bf16.mxu1 %v1773_v51 }
  0x80   :  { %1526 = vmatpush3.bf16.msra.mxu0 %v1774_v52  ;;  %1548 = vmatpush3.bf16.msra.mxu1 %v1775_v53 }
  0x81   :  { %1527 = vmatprep.subr.bf16.mxu0 %v1776_v54  ;;  %1549 = vmatprep.subr.bf16.mxu1 %v1777_v55 }
  0x84   :  { %1528 = vmatpush3.bf16.msra.mxu0 %v1778_v56  ;;  %1550 = vmatpush3.bf16.msra.mxu1 %v1779_v57 }
  0x85   :  { %1529 = vmatprep.subr.bf16.mxu0 %v1780_v58  ;;  %1551 = vmatprep.subr.bf16.mxu1 %v1781_v59 }
  0x88   :  { %1530 = vmatpush3.bf16.msra.mxu0 %v1782_v60  ;;  %1552 = vmatpush3.bf16.msra.mxu1 %v1783_v61 }
  0x89   :  { %1531 = vmatprep.subr.bf16.mxu0 %v1784_v62  ;;  %1553 = vmatprep.subr.bf16.mxu1 %v1785_v63  ;;  %v1801_v62 = vld [vmem:[%s2045_s7 + $0x8] sm:$0xff]   ;;  %v1511_v63 = vld [vmem:[%s2044_s6] ss:$0 sm:$0xff] }
  0x8c   :  { %1532 = vmatpush3.bf16.msra.mxu0 %v1786_v0  ;;  %1554 = vmatpush3.bf16.msra.mxu1 %v1787_v1 }
  0x8d   :  { %1533 = vmatprep.subr.bf16.mxu0 %v1788_v2  ;;  %1555 = vmatprep.subr.bf16.mxu1 %v1789_v3 }
  0x90   :  { %1534 = vmatpush3.bf16.msra.mxu0 %v1790_v4  ;;  %1556 = vmatpush3.bf16.msra.mxu1 %v1791_v5 }
  0x91   :  { %1535 = vmatprep.subr.bf16.mxu0 %v1792_v6  ;;  %1557 = vmatprep.subr.bf16.mxu1 %v1793_v7  ;;  %v1517_v7 = vld [vmem:[%s2046_s8] ss:$0 sm:$0xff] }
  0x94   :  { %1536 = vmatpush3.bf16.msra.mxu0 %v1794_v8  ;;  %1558 = vmatpush3.bf16.msra.mxu1 %v1795_v9 }
  0x95   :  { %1573 = vmatprep.subr.bf16.mxu0 %v1833_v10  ;;  %1585 = vmatprep.subr.bf16.mxu1 %v1833_v10 }
 0x14a   :  { %v763_v22 = vpop.f32.mrb[0].mxu0  ;;  %v845_v23 = vpop.f32.mrb[0].mxu1 }
 0x14b   :  { %v1593_v24 = vadd.f32 %v763_v22, %v154_v18  ;;  %v1595_v25 = vadd.f32 %v845_v23, %v162_v19  ;;  %v765_v26 = vpop.f32.mrb[1].mxu0  ;;  %v847_v27 = vpop.f32.mrb[1].mxu1 }
 0x14c   :  { %v1594_v28 = vadd.f32 %v765_v26, %v158_v20  ;;  %v1596_v29 = vadd.f32 %v847_v27, %v166_v21  ;;  %v767_v30 = vpop.f32.mrb[2].mxu0  ;;  %v849_v31 = vpop.f32.mrb[2].mxu1 }
 0x14d   :  { %v852_v32 = vmax.f32 %v1593_v24, 0.0  ;;  %v854_v33 = vmax.f32 %v1595_v25, 0.0  ;;  %v768_v34 = vpop.f32.mrb[3].mxu0  ;;  %v850_v35 = vpop.f32.mrb[3].mxu1 }
 0x14e   :  { %v853_v36 = vmax.f32 %v1594_v28, 0.0  ;;  %v855_v37 = vmax.f32 %v1596_v29, 0.0 }
 0x14f   :  { %v856_v41 = vpack.c.bf16 %v852_v32, %v852_v32  ;;  %v858_v42 = vpack.c.bf16 %v854_v33, %v854_v33 }
 0x150   :  { %v857_v38 = vpack.c.bf16 %v853_v36, %v853_v36  ;;  %v859_v39 = vpack.c.bf16 %v855_v37, %v855_v37 }
 0x152   :  { %1155 = vmatprep.mubr.bf16.mxu0 %v857_v38  ;;  %1195 = vmatprep.mubr.bf16.mxu1 %v859_v39 }
 0x153   :  { %1156 = vmatmul.mubr.bf16.vlgmr.msra.gmra.mrb[4].mxu0 %v856_v41  ;;  %1196 = vmatmul.mubr.bf16.vlgmr.msra.gmra.mrb[4].mxu1 %v858_v42 }
 0x154   :  { %1574 = vmatpush3.bf16.msra.mxu0 %v1796_v40  ;;  %1581 = vmatprep.mubr.msk.bf16.mxu0 %vm1834_vm1, %v1833_v10 }
 0x155   :  { %1575 = vmatprep.subr.bf16.mxu0 %v1833_v10  ;;  %1589 = vmatprep.mubr.msk.bf16.mxu1 %vm1834_vm1, %v1833_v10 }
 0x156   :  { %1586 = vmatpush3.bf16.msra.mxu1 %v1800_v46 }
 0x157   :  { %1587 = vmatprep.subr.bf16.mxu1 %v1833_v10 }
 0x158   :  { %1576 = vmatpush3.bf16.msra.mxu0 %v1797_v43 }
 0x159   :  { %1577 = vmatprep.subr.bf16.mxu0 %v1833_v10 }
 0x15a   :  { %1588 = vmatpush3.bf16.msra.mxu1 %v1801_v62 }
 0x15c   :  { %1578 = vmatpush3.bf16.msra.mxu0 %v1798_v44 }
 0x15d   :  { %1579 = vmatprep.subr.bf16.mxu0 %v1833_v10 }
 0x160   :  { %1580 = vmatpush3.bf16.msra.mxu0 %v1799_v45 }
 0x226   :  { %v1537_v47 = vpop.f32.mrb[4].mxu0  ;;  %v1559_v48 = vpop.f32.mrb[4].mxu1 }
 0x227   :  { %v1538_v50 = vpop.f32.mrb[5].mxu0  ;;  %v1560_v51 = vpop.f32.mrb[5].mxu1 }
 0x228   :  { %v1539_v52 = vadd.f32 %v1538_v50, %v1537_v47  ;;  %v1561_v53 = vadd.f32 %v1560_v51, %v1559_v48  ;;  %v1540_v54 = vpop.f32.mrb[6].mxu0  ;;  %v1562_v55 = vpop.f32.mrb[6].mxu1 }
 0x229   :  { %v1541_v56 = vpop.f32.mrb[7].mxu0  ;;  %v1563_v57 = vpop.f32.mrb[7].mxu1 }
 0x22a   :  { %v1158_v58 = vadd.f32 %v1539_v52, %v1478_v49 }
 0x22c   :  { %v1198_v59 = vadd.f32 %v1561_v53, %v1158_v58 }
 0x22e   :  { %v1203_v60 = vmax.f32 %v1198_v59, 0.0 }
 0x230   :  { %v1204_v61 = vpack.c.bf16 %v1203_v60, %v1203_v60 }
 0x232   :  { %1582 = vmatmul.mubr.msk.bf16.vlgmr.msra.gmra.mrb[8].mxu0 %vm1244_vm2, %v1204_v61 }
 0x305   :  { %v1282_v0 = vpop.f32.mrb[8].mxu0 }
 0x306   :  { %v1283_v1 = vadd.f32 %v1511_v63, %v1282_v0  ;;  %v1583_v2 = vpop.f32.mrb[9].mxu0 }
 0x307   :  { %v1285_v3 = vpop.f32.mrb[10].mxu0 }
 0x308   :  { %v1288_v4 = vmax.f32 %v1283_v1, 0.0  ;;  %v1584_v5 = vpop.f32.mrb[11].mxu0 }
 0x30a   :  { %v1289_v6 = vpack.c.bf16 %v1288_v4, %v1288_v4 }
 0x30c   :  { %1590 = vmatmul.mubr.msk.bf16.vlgmr.msra.gmra.mrb[8].mxu1 %vm1313_vm3, %v1289_v6 }
 0x3df   :  { %v1351_v8 = vpop.f32.mrb[8].mxu1 }
 0x3e0   :  { %v1352_v9 = vadd.f32 %v1517_v7, %v1351_v8  ;;  %v1591_v10 = vpop.f32.mrb[9].mxu1 }
 0x3e1   :  { %v1354_v11 = vpop.f32.mrb[10].mxu1 }
 0x3e2   :  { %1357 = vmax.xlane.f32.xlu0 %v1352_v9  ;;  %v1592_v12 = vpop.f32.mrb[11].mxu1 }
 0x46f   :  { %v1358_v13 = vpop.xlane.xlu0 %1357 }
 0x470   :  { %v1359_v14 = vsub.f32 %v1352_v9, %v1358_v13 }
 0x472   :  { %v1360_v15 = vmul.f32 1.442695, %v1359_v14 }
 0x474   :  { %1802 = vpow2.f32 %v1360_v15 }
 0x47e   :  { %v1803_v16 = vpop.eup %1802 }
 0x47f   :  { %1362 = vadd.xlane.f32.xlu0 %v1803_v16 }
 0x50c   :  { %v1363_v17 = vpop.xlane.xlu0 %1362 }
 0x50d   :  { %1804 = vrcp.f32 %v1363_v17 }
 0x517   :  { %v1805_v18 = vpop.eup %1804 }
 0x518   :  { %v1365_v19 = vmul.f32 %v1805_v18, %v1803_v16 }
 0x51a   :  { %1366 = vst [vmem:[%s2047_s9] sm:$0xff] %v1365_v19 }
 0x51b   :  { %1371 = vsyncpa [#allocation3], 1 }

</bundles_post_ra>
